<compile_context>
chip_gen: v5e
topology: v5e:2x2
jax: 0.10.0
libtpu: 0.0.40
codegen_flags: <defaults>
</compile_context>

<pallas_src>
import functools

import jax
import jax.numpy as jnp
from jax.experimental import pallas as pl
from jax.experimental.pallas import tpu as pltpu

_MIB = 1024 * 1024


def _round_up(n: int, m: int) -> int:
    return (n + m - 1) // m * m


def _vmem_capacity_bytes(default: int = 64 * _MIB) -> int:
    """Physical VMEM per TensorCore (v5e/v6e: 128 MiB, v7x: 64 MiB)."""
    try:
        cap = getattr(pltpu.get_tpu_info(), "vmem_capacity_bytes", None)
        cap = int(cap) if cap else default
    except Exception:  # query unavailable -> conservative (v7x) default
        cap = default
    return max(cap, 32 * _MIB)


def _pad2(a, rows, cols):
    pr, pc = rows - a.shape[0], cols - a.shape[1]
    return jnp.pad(a, ((0, pr), (0, pc))) if (pr or pc) else a


def _ffn_kernel(x_ref, w1_ref, b1_ref, w2_ref, b2_ref, o_ref, acc_ref, *, hid_chunk):
    # x_ref:  (row_tile, dm_p)        native or compute dtype
    # w1_ref: (dm_p, hid_block)       compute dtype (whole array if resident)
    # b1_ref: (1, hid_block)          f32
    # w2_ref: (hid_block, dm_p)       compute dtype
    # b2_ref: (1, dm_p)               f32
    # o_ref:  (row_tile, dm_p)        output dtype
    # acc_ref:(row_tile, dm_p)        f32 VMEM scratch (persists across hid grid axis)
    j = pl.program_id(1)

    @pl.when(j == 0)
    def _init():
        acc_ref[...] = jnp.zeros_like(acc_ref)

    # Cast once per x tile; hidden under MXU time. No-op if already compute dtype.
    x = x_ref[...].astype(w1_ref.dtype)

    hid_block = w1_ref.shape[1]
    # Static-offset chunking of the hidden dim keeps the f32/bf16 intermediates
    # bounded to (row_tile, hid_chunk) while W1/W2 stay resident in VMEM.
    # Offsets/sizes are static multiples of 128 -> zero-cost, lane-aligned views.
    for off in range(0, hid_block, hid_chunk):
        size = min(hid_chunk, hid_block - off)
        h = jnp.dot(x, w1_ref[:, pl.ds(off, size)],
                    preferred_element_type=jnp.float32)
        h = jnp.maximum(h + b1_ref[:, pl.ds(off, size)], 0.0)
        # Dropout: eval-mode identity.
        # TODO(synk): training-mode dropout (stateful PRNG masking) not implemented.
        h = h.astype(w2_ref.dtype)
        acc_ref[...] += jnp.dot(h, w2_ref[pl.ds(off, size), :],
                                preferred_element_type=jnp.float32)

    @pl.when(j == pl.num_programs(1) - 1)
    def _finalize():
        o_ref[...] = (acc_ref[...] + b2_ref[...]).astype(o_ref.dtype)


def positionwise_ffn(x, w1, b1, w2, b2, *, row_tile=512,
                     compute_dtype=jnp.bfloat16):
    """relu(x @ W1 + b1) @ W2 + b2 with eval-mode dropout.

    x: [batch, seq, d_model]; W1: [d_model, hidden]; W2: [hidden, d_model].
    Returns [batch, seq, d_model] in x.dtype.
    """
    batch, seq, d_model = x.shape
    hidden = w1.shape[1]
    out_dtype = x.dtype
    rows = batch * seq

    # Lane-dense (multiple-of-128) feature dims -> unmasked vst, full vreg use.
    dm_p = _round_up(d_model, 128)
    hid_p = _round_up(hidden, 128)

    # Row tile: multiple of 8 sublanes, no larger than the row-padded input.
    row_tile = _round_up(max(8, min(row_tile, _round_up(rows, 8))), 8)

    c_isz = jnp.dtype(compute_dtype).itemsize
    o_isz = jnp.dtype(out_dtype).itemsize
    x_isz = max(jnp.dtype(x.dtype).itemsize, c_isz)   # upper bound for either path

    capacity = _vmem_capacity_bytes()
    budget = capacity - 8 * _MIB                      # compiler-scratch headroom
    hid_chunk = min(hid_p, 2048)

    def resident_bytes(rt):
        return (2 * rt * dm_p * x_isz                 # x double buffer
                + 2 * rt * dm_p * o_isz               # out double buffer
                + 2 * dm_p * hid_p * c_isz            # W1 + W2, single resident copy
                + (hid_p + dm_p) * 4                  # biases (f32)
                + rt * dm_p * 4                       # f32 accumulator scratch
                + rt * hid_chunk * (4 + c_isz)        # f32 + bf16 hidden chunk
                + rt * dm_p * c_isz)                  # in-kernel compute-dtype x copy

    def streaming_bytes(rt, ht):
        return (2 * rt * dm_p * x_isz
                + 2 * rt * dm_p * o_isz
                + 4 * dm_p * ht * c_isz               # W1/W2 blocks, double-buffered
                + 2 * (ht + dm_p) * 4
                + rt * dm_p * 4
                + rt * min(ht, hid_chunk) * (4 + c_isz)
                + rt * dm_p * c_isz)

    # Plan selection: resident weights if they fit (shrink row_tile first),
    # otherwise stream hidden-dim weight blocks over a second grid axis.
    hid_tile = hid_p
    while row_tile > 64 and resident_bytes(row_tile) > budget:
        row_tile = max(64, _round_up(row_tile // 2, 8))
    if resident_bytes(row_tile) > budget:
        hid_divisors = [d for d in range(128, hid_p + 1, 128) if hid_p % d == 0]
        hid_tile = next((d for d in reversed(hid_divisors)
                         if streaming_bytes(row_tile, d) <= budget),
                        hid_divisors[0])
        while row_tile > 8 and streaming_bytes(row_tile, hid_tile) > budget:
            row_tile = max(8, _round_up(row_tile // 2, 8))
        if streaming_bytes(row_tile, hid_tile) > budget:
            raise ValueError(
                "PositionwiseFeedForward does not fit in VMEM even with minimal "
                f"tiles (d_model={d_model}, hidden={hidden}).")
    hid_chunk = min(hid_tile, hid_chunk)
    n_hid_tiles = hid_p // hid_tile

    rows_p = _round_up(rows, row_tile)
    n_row_tiles = rows_p // row_tile
    # v7x megacore: the row axis is 'parallel' -> prefer an even row-tile count so
    # both TensorCores get balanced work (harmless on single-TC v5e/v6e).
    if n_row_tiles > 1 and n_row_tiles % 2 == 1:
        even_tiles = n_row_tiles + 1
        row_tile = max(8, _round_up(-(-rows // even_tiles), 8))
        rows_p = row_tile * even_tiles
        n_row_tiles = even_tiles

    # Prepare inputs. Only pay a wrapper-side HBM pass for x when padding is
    # actually required; otherwise pass it native and cast inside the kernel.
    needs_pad = (dm_p != d_model) or (rows_p != rows)
    x2d = x.reshape(rows, d_model)
    if needs_pad:
        x2d = jnp.pad(x2d.astype(compute_dtype),
                      ((0, rows_p - rows), (0, dm_p - d_model)))
    w1_p = _pad2(w1.astype(compute_dtype), dm_p, hid_p)
    w2_p = _pad2(w2.astype(compute_dtype), hid_p, dm_p)
    b1_p = _pad2(b1.astype(jnp.float32).reshape(1, hidden), 1, hid_p)
    b2_p = _pad2(b2.astype(jnp.float32).reshape(1, d_model), 1, dm_p)

    x_spec = pl.BlockSpec((row_tile, dm_p), lambda i, j: (i, 0))
    out_spec = pl.BlockSpec((row_tile, dm_p), lambda i, j: (i, 0))
    if n_hid_tiles == 1:
        # Resident path: whole weight/bias arrays pinned once in VMEM
        # (single buffer, never re-fetched across the row grid).
        vmem_full = pl.BlockSpec(memory_space=pltpu.MemorySpace.VMEM)
        w1_spec = b1_spec = w2_spec = b2_spec = vmem_full
        plan_bytes = resident_bytes(row_tile)
        weight_passes = 1
    else:
        # Streaming path: hidden axis is the (last, 'arbitrary') reduction axis.
        w1_spec = pl.BlockSpec((dm_p, hid_tile), lambda i, j: (0, j))
        b1_spec = pl.BlockSpec((1, hid_tile), lambda i, j: (0, j))
        w2_spec = pl.BlockSpec((hid_tile, dm_p), lambda i, j: (j, 0))
        b2_spec = pl.BlockSpec((1, dm_p), lambda i, j: (0, 0))
        plan_bytes = streaming_bytes(row_tile, hid_tile)
        weight_passes = n_row_tiles

    vmem_limit = int(min(capacity - 4 * _MIB,
                         max(plan_bytes + 8 * _MIB, 32 * _MIB)))

    flops = 4 * rows_p * dm_p * hid_p   # two matmuls, 2 flops per MAC
    bytes_accessed = int(
        x2d.size * jnp.dtype(x2d.dtype).itemsize
        + (w1_p.size + w2_p.size) * c_isz * weight_passes
        + (b1_p.size + b2_p.size) * 4
        + rows_p * dm_p * o_isz)
    cost = pl.CostEstimate(flops=flops, transcendentals=0,
                           bytes_accessed=bytes_accessed)

    kernel = functools.partial(_ffn_kernel, hid_chunk=hid_chunk)

    out2d = pl.pallas_call(
        kernel,
        out_shape=jax.ShapeDtypeStruct((rows_p, dm_p), out_dtype),
        grid_spec=pltpu.PrefetchScalarGridSpec(
            num_scalar_prefetch=0,
            grid=(n_row_tiles, n_hid_tiles),
            in_specs=[x_spec, w1_spec, b1_spec, w2_spec, b2_spec],
            out_specs=out_spec,
            scratch_shapes=[pltpu.VMEM((row_tile, dm_p), jnp.float32)],
        ),
        compiler_params=pltpu.CompilerParams(
            dimension_semantics=("parallel", "arbitrary"),
            vmem_limit_bytes=vmem_limit,
        ),
        cost_estimate=cost,
    )(x2d, w1_p, b1_p, w2_p, b2_p)

    return out2d[:rows, :d_model].reshape(batch, seq, d_model)


def _init_linear(key, in_features, out_features):
    # Deterministic init mimicking nn.Linear: U(-1/sqrt(in), 1/sqrt(in)).
    # Stored (in, out) so the kernel does x @ W (same math as torch's x @ W.T).
    kw, kb = jax.random.split(key)
    bound = 1.0 / (in_features ** 0.5)
    w = jax.random.uniform(kw, (in_features, out_features), jnp.float32,
                           minval=-bound, maxval=bound)
    b = jax.random.uniform(kb, (out_features,), jnp.float32,
                           minval=-bound, maxval=bound)
    return w, b


if __name__ == "__main__":
    d_model, hidden = 32, 64
    batch, seq = 2, 8

    key = jax.random.PRNGKey(0)
    k_x, k_l1, k_l2 = jax.random.split(key, 3)

    x = jax.random.normal(k_x, (batch, seq, d_model), jnp.float32)
    w1, b1 = _init_linear(k_l1, d_model, hidden)
    w2, b2 = _init_linear(k_l2, hidden, d_model)

    out = positionwise_ffn(x, w1, b1, w2, b2)
    out = jax.block_until_ready(out)
    assert out.shape == (batch, seq, d_model)

    # Reference with the same bf16 operand rounding (kernel accumulates in f32).
    f32 = jnp.float32
    xb = x.astype(jnp.bfloat16).astype(f32)
    w1b = w1.astype(jnp.bfloat16).astype(f32)
    w2b = w2.astype(jnp.bfloat16).astype(f32)
    h_ref = jnp.maximum(xb @ w1b + b1, 0.0).astype(jnp.bfloat16).astype(f32)
    ref_bf16 = h_ref @ w2b + b2
    assert jnp.allclose(out, ref_bf16, atol=1e-2, rtol=1e-2)

    # Full-f32 module reference (eval-mode dropout == identity).
    ref_f32 = jnp.maximum(x @ w1 + b1, 0.0) @ w2 + b2
    assert jnp.allclose(out, ref_f32, atol=1e-1, rtol=1e-1)

    print("KERNEL_OK")
</pallas_src>

<mosaic_0001>
module attributes {stable_mosaic.version = 11 : i64} {
  func.func @_ffn_kernel(%arg0: i32, %arg1: i32, %arg2: memref<16x128xbf16, #tpu.memory_space<vmem>>, %arg3: memref<128x128xbf16, #tpu.memory_space<vmem>>, %arg4: memref<1x128xf32, #tpu.memory_space<vmem>>, %arg5: memref<128x128xbf16, #tpu.memory_space<vmem>>, %arg6: memref<1x128xf32, #tpu.memory_space<vmem>>, %arg7: memref<16x128xf32, #tpu.memory_space<vmem>>, %arg8: memref<16x128xf32, #tpu.memory_space<vmem>>) attributes {dimension_semantics = [#tpu.dimension_semantics<parallel>, #tpu.dimension_semantics<arbitrary>], iteration_bounds = array<i64: 1, 1>, scalar_prefetch = 0 : i64, scratch_operands = 1 : i64, tpu.core_type = #tpu.core_type<tc>, window_params = [{transform_indices = @transform_0, window_bounds = array<i64: 16, 128>}, {pipeline_mode = #tpu.pipeline_mode<synchronous>, transform_indices = @transform_1, window_bounds = array<i64: 128, 128>}, {pipeline_mode = #tpu.pipeline_mode<synchronous>, transform_indices = @transform_2, window_bounds = array<i64: 1, 128>}, {pipeline_mode = #tpu.pipeline_mode<synchronous>, transform_indices = @transform_3, window_bounds = array<i64: 128, 128>}, {pipeline_mode = #tpu.pipeline_mode<synchronous>, transform_indices = @transform_4, window_bounds = array<i64: 1, 128>}, {transform_indices = @transform_5, window_bounds = array<i64: 16, 128>}]} {
    %c0_i32 = arith.constant 0 : i32
    %0 = arith.cmpi eq, %arg1, %c0_i32 : i32
    %1 = arith.extui %0 : i1 to i32
    %c0_i32_0 = arith.constant 0 : i32
    %2 = arith.cmpi ne, %1, %c0_i32_0 : i32
    scf.if %2 {
      %cst_16 = arith.constant 0.000000e+00 : f32
      %20 = vector.broadcast %cst_16 : f32 to vector<16x128xf32>
      %c0_17 = arith.constant 0 : index
      %c0_18 = arith.constant 0 : index
      %21 = vector.load %arg8[%c0_17, %c0_18] : memref<16x128xf32, #tpu.memory_space<vmem>>, vector<16x128xf32>
      tpu.vector_store %arg8[%c0_17, %c0_18], %20 {strides = array<i32>} : memref<16x128xf32, #tpu.memory_space<vmem>>, vector<16x128xf32>,
    } else {
    }
    %c0 = arith.constant 0 : index
    %c0_1 = arith.constant 0 : index
    %3 = vector.load %arg2[%c0, %c0_1] : memref<16x128xbf16, #tpu.memory_space<vmem>>, vector<16x128xbf16>
    %c0_2 = arith.constant 0 : index
    %c0_3 = arith.constant 0 : index
    %4 = vector.load %arg3[%c0_2, %c0_3] : memref<128x128xbf16, #tpu.memory_space<vmem>>, vector<128x128xbf16>
    %cst = arith.constant dense<0.000000e+00> : vector<16x128xf32>
    %5 = tpu.matmul %3, %4, %cst {dimension_numbers = #tpu.dot_dimension_numbers<[1], [0], [0], [1], [0, 0, 1, 1], [], []>} : vector<16x128xbf16>, vector<128x128xbf16>, vector<16x128xf32> -> vector<16x128xf32>
    %c0_4 = arith.constant 0 : index
    %c0_5 = arith.constant 0 : index
    %6 = vector.load %arg4[%c0_4, %c0_5] : memref<1x128xf32, #tpu.memory_space<vmem>>, vector<1x128xf32>
    %7 = vector.broadcast %6 : vector<1x128xf32> to vector<16x128xf32>
    %8 = arith.addf %5, %7 : vector<16x128xf32>
    %cst_6 = arith.constant 0.000000e+00 : f32
    %9 = vector.broadcast %cst_6 : f32 to vector<16x128xf32>
    %10 = arith.maximumf %8, %9 : vector<16x128xf32>
    %11 = arith.truncf %10 : vector<16x128xf32> to vector<16x128xbf16>
    %c0_7 = arith.constant 0 : index
    %c0_8 = arith.constant 0 : index
    %12 = vector.load %arg8[%c0_7, %c0_8] : memref<16x128xf32, #tpu.memory_space<vmem>>, vector<16x128xf32>
    %c0_9 = arith.constant 0 : index
    %c0_10 = arith.constant 0 : index
    %13 = vector.load %arg5[%c0_9, %c0_10] : memref<128x128xbf16, #tpu.memory_space<vmem>>, vector<128x128xbf16>
    %cst_11 = arith.constant dense<0.000000e+00> : vector<16x128xf32>
    %14 = tpu.matmul %11, %13, %cst_11 {dimension_numbers = #tpu.dot_dimension_numbers<[1], [0], [0], [1], [0, 0, 1, 1], [], []>} : vector<16x128xbf16>, vector<128x128xbf16>, vector<16x128xf32> -> vector<16x128xf32>
    %15 = arith.addf %12, %14 : vector<16x128xf32>
    %c0_12 = arith.constant 0 : index
    %c0_13 = arith.constant 0 : index
    %16 = vector.load %arg8[%c0_12, %c0_13] : memref<16x128xf32, #tpu.memory_space<vmem>>, vector<16x128xf32>
    tpu.vector_store %arg8[%c0_12, %c0_13], %15 {strides = array<i32>} : memref<16x128xf32, #tpu.memory_space<vmem>>, vector<16x128xf32>,
    %c0_i32_14 = arith.constant 0 : i32
    %17 = arith.cmpi eq, %arg1, %c0_i32_14 : i32
    %18 = arith.extui %17 : i1 to i32
    %c0_i32_15 = arith.constant 0 : i32
    %19 = arith.cmpi ne, %18, %c0_i32_15 : i32
    scf.if %19 {
      %c0_16 = arith.constant 0 : index
      %c0_17 = arith.constant 0 : index
      %20 = vector.load %arg8[%c0_16, %c0_17] : memref<16x128xf32, #tpu.memory_space<vmem>>, vector<16x128xf32>
      %c0_18 = arith.constant 0 : index
      %c0_19 = arith.constant 0 : index
      %21 = vector.load %arg6[%c0_18, %c0_19] : memref<1x128xf32, #tpu.memory_space<vmem>>, vector<1x128xf32>
      %22 = vector.broadcast %21 : vector<1x128xf32> to vector<16x128xf32>
      %23 = arith.addf %20, %22 : vector<16x128xf32>
      %c0_20 = arith.constant 0 : index
      %c0_21 = arith.constant 0 : index
      %24 = vector.load %arg7[%c0_20, %c0_21] : memref<16x128xf32, #tpu.memory_space<vmem>>, vector<16x128xf32>
      tpu.vector_store %arg7[%c0_20, %c0_21], %23 {strides = array<i32>} : memref<16x128xf32, #tpu.memory_space<vmem>>, vector<16x128xf32>,
    } else {
    }
    return
  }
  func.func @transform_0(%arg0: i32, %arg1: i32) -> (i32, i32) {
    %c0_i32 = arith.constant 0 : i32
    %c0_i32_0 = arith.constant 0 : i32
    return %arg0, %c0_i32 : i32, i32
  }
  func.func @transform_1(%arg0: i32, %arg1: i32) -> (i32, i32) {
    %c0_i32 = arith.constant 0 : i32
    %c0_i32_0 = arith.constant 0 : i32
    %c0_i32_1 = arith.constant 0 : i32
    return %c0_i32, %c0_i32_0 : i32, i32
  }
  func.func @transform_2(%arg0: i32, %arg1: i32) -> (i32, i32) {
    %c0_i32 = arith.constant 0 : i32
    %c0_i32_0 = arith.constant 0 : i32
    %c0_i32_1 = arith.constant 0 : i32
    return %c0_i32, %c0_i32_0 : i32, i32
  }
  func.func @transform_3(%arg0: i32, %arg1: i32) -> (i32, i32) {
    %c0_i32 = arith.constant 0 : i32
    %c0_i32_0 = arith.constant 0 : i32
    %c0_i32_1 = arith.constant 0 : i32
    return %c0_i32, %c0_i32_0 : i32, i32
  }
  func.func @transform_4(%arg0: i32, %arg1: i32) -> (i32, i32) {
    %c0_i32 = arith.constant 0 : i32
    %c0_i32_0 = arith.constant 0 : i32
    %c0_i32_1 = arith.constant 0 : i32
    return %c0_i32, %c0_i32_0 : i32, i32
  }
  func.func @transform_5(%arg0: i32, %arg1: i32) -> (i32, i32) {
    %c0_i32 = arith.constant 0 : i32
    %c0_i32_0 = arith.constant 0 : i32
    return %arg0, %c0_i32 : i32, i32
  }
}

</mosaic_0001>

<bundles_post_ra>
// kernel: tpu_custom_call.1
= control target key start
LH: loop header
LB: loop body
LE: loop exit
PB: predicated region body
PF: predicated region fallthrough
CT: control target
= control target key end

     0   :  { %10 = vsyncpa [#allocation4], 0  ;;  %s537_s0 = inlined_call_operand.hbm [shape: bf16[16,128], index: 0, kind: input, shape index: {}]   ;;  %s538_s1 = inlined_call_operand.hbm [shape: bf16[128,128], index: 1, kind: input, shape index: {}]   ;;  %s539_s2 = inlined_call_operand.vmem [shape: f32[1,128], index: 2, kind: input, shape index: {}]   ;;  %s540_s3 = inlined_call_operand.hbm [shape: bf16[128,128], index: 3, kind: input, shape index: {}]   ;;  %s541_s4 = inlined_call_operand.vmem [shape: f32[1,128], index: 4, kind: input, shape index: {}]   ;;  %s542_s5 = inlined_call_operand.hbm [shape: f32[16,128], index: 5, kind: output, shape index: {}]  }
   0x1   :  { %11 = vsyncpa [#allocation7], 0 }
   0x2   :  { %12 = vsyncpa [#allocation5], 0  ;;  %s30_s20 = sshll.u32 %s538_s1, 4  ;;  %s481_s21 = smov [#allocation6]   ;;  %s31_s20 = int_to_ptr.hbm [resolvable:$true] %s30_s20 }
   0x3   :  { %s32_s22 = sshll.u32 %s481_s21, 4  ;;  %s17_s25 = sshll.u32 %s537_s0, 4  ;;  %s33_s22 = int_to_ptr.vmem [resolvable:$true] %s32_s22  ;;  %s18_s25 = int_to_ptr.hbm [resolvable:$true] %s17_s25 }
   0x4   :  { %s482_s26 = smov 64   ;;  %s483_s27 = smov 4  }
   0x5   :  { %38 = dma.hbm_to_vmem [thread:$0]  %s31_s20, 1024, %s33_s22, [#allocation7], %s482_s26, %s482_s26, %s483_s27  }
   0x6   :  { %s484_s28 = smov [#allocation3]   ;;  %s45_s7 = sshll.u32 %s540_s3, 4  ;;  %s46_s7 = int_to_ptr.hbm [resolvable:$true] %s45_s7 }
   0x7   :  { %s19_s29 = sshll.u32 %s484_s28, 4  ;;  %s485_s1 = smov [#allocation8]   ;;  %s20_s29 = int_to_ptr.vmem [resolvable:$true] %s19_s29 }
   0x8   :  { %25 = dma.hbm_to_vmem [thread:$0]  %s18_s25, 128, %s20_s29, [#allocation4], %s482_s26, %s482_s26, %s483_s27  }
   0x9   :  { %s47_s8 = sshll.u32 %s485_s1, 4  ;;  %s48_s8 = int_to_ptr.vmem [resolvable:$true] %s47_s8 }
   0xa   :  { %53 = dma.hbm_to_vmem [thread:$0]  %s46_s7, 1024, %s48_s8, [#allocation7], %s482_s26, %s482_s26, %s483_s27  }
   0xb   :  { %475 = dma.done.wait [#allocation4], 128  }
   0xc   :  { %476 = vsyncadd [#allocation4], 4294967168 }
   0xd   :  { %477 = dma.done.wait [#allocation7], 2048  }
   0xe   :  { %478 = vsyncadd [#allocation7], 4294965248  ;;  %v360_v0 = vld [vmem:[#allocation6 + $0x38] sm:$0xff]  ;;  %v359_v1 = vld [vmem:[#allocation6 + $0x30] sm:$0xff]  ;;  %s486_s11 = smov [#allocation9]   ;;  %s487_s15 = smov 128  }
   0xf   :  { %150 = vmatpush.bf16.msra.mxu0 %v360_v0  ;;  %v368_v2 = vld [vmem:[#allocation8 + $0x38] sm:$0xff]  ;;  %v367_v3 = vld [vmem:[#allocation8 + $0x30] sm:$0xff]  ;;  %v358_v4 = vld [vmem:[#allocation6 + $0x28] sm:$0xff]  ;;  %s268_s12 = sshll.u32 %s486_s11, 4  ;;  %s488_s16 = smov 8   ;;  %s269_s12 = int_to_ptr.vmem [resolvable:$true] %s268_s12 }
  0x10   :  { %233 = vmatpush.bf16.msra.mxu1 %v368_v2  ;;  %v366_v5 = vld [vmem:[#allocation8 + $0x28] sm:$0xff]  ;;  %v357_v6 = vld [vmem:[#allocation6 + $0x20] sm:$0xff]  ;;  %v356_v8 = vld [vmem:[#allocation6 + $0x18] sm:$0xff] }
  0x11   :  { %v365_v7 = vld [vmem:[#allocation8 + $0x20] sm:$0xff]  ;;  %v355_v9 = vld [vmem:[#allocation6 + $0x10] sm:$0xff]  ;;  %v354_v10 = vld [vmem:[#allocation6 + $0x8] sm:$0xff] }
  0x12   :  { %v353_v11 = vld [vmem:[#allocation6] sm:$0xff]  ;;  %v352_v12 = vld [vmem:[#allocation3] sm:$0xff]  ;;  %v363_v14 = vld [vmem:[#allocation8 + $0x10] sm:$0xff] }
  0x13   :  { %151 = vmatpush.bf16.msra.mxu0 %v359_v1  ;;  %v364_v13 = vld [vmem:[#allocation8 + $0x18] sm:$0xff]  ;;  %v362_v15 = vld [vmem:[#allocation8 + $0x8] sm:$0xff]  ;;  %v361_v16 = vld [vmem:[#allocation8] sm:$0xff] }
  0x14   :  { %234 = vmatpush.bf16.msra.mxu1 %v367_v3  ;;  %v377_v18 = vld [vmem:[%s539_s2] ss:$0 sm:$0xff]  ;;  %s270_s2 = sshll.u32 %s542_s5, 4  ;;  %s271_s2 = int_to_ptr.hbm [resolvable:$true] %s270_s2 }
  0x15   :  { %v378_v25 = vld [vmem:[%s541_s4] ss:$0 sm:$0xff] }
  0x17   :  { %152 = vmatpush.bf16.msra.mxu0 %v358_v4 }
  0x18   :  { %235 = vmatpush.bf16.msra.mxu1 %v366_v5 }
  0x1b   :  { %153 = vmatpush.bf16.msra.mxu0 %v357_v6 }
  0x1c   :  { %236 = vmatpush.bf16.msra.mxu1 %v365_v7 }
  0x1f   :  { %154 = vmatpush.bf16.msra.mxu0 %v356_v8 }
  0x20   :  { %237 = vmatpush.bf16.msra.mxu1 %v364_v13 }
  0x23   :  { %155 = vmatpush.bf16.msra.mxu0 %v355_v9 }
  0x24   :  { %238 = vmatpush.bf16.msra.mxu1 %v363_v14 }
  0x27   :  { %156 = vmatpush.bf16.msra.mxu0 %v354_v10 }
  0x28   :  { %239 = vmatpush.bf16.msra.mxu1 %v362_v15 }
  0x2b   :  { %157 = vmatpush.bf16.msra.mxu0 %v353_v11 }
  0x2c   :  { %240 = vmatpush.bf16.msra.mxu1 %v361_v16 }
  0x2e   :  { %158 = vmatmul.bf16.vlgmr.msra.gmra.mxu0 %v352_v12 }
  0xab   :  { %v159_v17 = vpop.f32.mrf.mxu0 }
  0xac   :  { %v160_v19 = vadd.f32 %v377_v18, %v159_v17 }
  0xae   :  { %v164_v22 = vmax.f32 %v160_v19, 0.0 }
  0xb3   :  { %v161_v20 = vpop.f32.mrf.mxu0 }
  0xb4   :  { %v162_v21 = vadd.f32 %v377_v18, %v161_v20 }
  0xb6   :  { %v165_v23 = vmax.f32 %v162_v21, 0.0 }
  0xb8   :  { %v166_v24 = vpack.c.bf16 %v165_v23, %v164_v22 }
  0xba   :  { %241 = vmatmul.bf16.vlgmr.msra.gmra.mxu1 %v166_v24 }
 0x137   :  { %v242_v26 = vpop.f32.mrf.mxu1 }
 0x138   :  { %v260_v27 = vadd.f32 %v378_v25, %v242_v26 }
 0x13a   :  { %262 = vst [vmem:[#allocation9] sm:$0xff] %v260_v27 }
 0x13f   :  { %v244_v28 = vpop.f32.mrf.mxu1 }
 0x140   :  { %v261_v29 = vadd.f32 %v378_v25, %v244_v28 }
 0x142   :  { %263 = vst [vmem:[#allocation9 + $0x8] sm:$0xff] %v261_v29 }
 0x143   :  { %276 = dma.vmem_to_hbm [thread:$0]  %s269_s12, 256, %s271_s2, [#allocation5], %s487_s15, %s487_s15, %s488_s16  }
 0x144   :  { %479 = dma.done.wait [#allocation5], 256  }
 0x145   :  { %480 = vsyncadd [#allocation5], 4294967040 }
 0x146   :  { %281 = vsyncpa [#allocation4], 1 }
 0x147   :  { %282 = vsyncpa [#allocation7], 1 }
 0x148   :  { %283 = vsyncpa [#allocation5], 1 }

</bundles_post_ra>
